<compile_context>
chip_gen: v5e
topology: v5e:2x2
jax: 0.10.0
libtpu: 0.0.40
codegen_flags: <defaults>
</compile_context>

<pallas_src>
import math
from functools import partial

import jax
import jax.numpy as jnp
from jax.experimental import pallas as pl
from jax.experimental.pallas import tpu as pltpu


def _attention_kernel(q_ref, k_ref, v_ref, o_ref, *maybe_a_ref,
                      scale, mask_flag, heads, e_dim, d_dim):
    # q_ref: (1, TL, H*E)  k_ref: (1, S, H*E)  v_ref: (1, S, H*D)
    # o_ref: (1, TL, H*D)  optional a_ref: (1, H, TL, S)
    a_ref = maybe_a_ref[0] if maybe_a_ref else None

    tile_l = q_ref.shape[1]
    seq_s = k_ref.shape[1]
    row0 = pl.program_id(1) * tile_l

    if mask_flag:
        # Causal mask for this L tile, shared across all heads (built once).
        rows = row0 + jax.lax.broadcasted_iota(jnp.int32, (tile_l, seq_s), 0)
        cols = jax.lax.broadcasted_iota(jnp.int32, (tile_l, seq_s), 1)
        masked = cols > rows                     # True where score is masked out
    else:
        masked = None

    for h in range(heads):
        # Static lane slices: each head's features live at a fixed column range.
        qh = q_ref[0, :, h * e_dim:(h + 1) * e_dim]          # (TL, E)
        kh = k_ref[0, :, h * e_dim:(h + 1) * e_dim]          # (S,  E)
        vh = v_ref[0, :, h * d_dim:(h + 1) * d_dim]          # (S,  D)

        # Fold the softmax scale into q (E-wide instead of S-wide scaling).
        qh = qh * scale

        # scores[l, s] = sum_e qh[l, e] * kh[s, e]; MXU in input dtype, f32 acc.
        scores = jax.lax.dot_general(
            qh, kh, (((1,), (1,)), ((), ())),
            preferred_element_type=jnp.float32)              # (TL, S)

        if mask_flag:
            # Large-negative finite fill == -inf after softmax, but avoids NaNs
            # for (degenerate) fully-masked rows.
            scores = jnp.where(masked, jnp.float32(-1e30), scores)

        # Numerically-stable softmax along S.
        m = jnp.max(scores, axis=-1, keepdims=True)
        p = jnp.exp(scores - m)
        denom = jnp.sum(p, axis=-1, keepdims=True)
        attn = p * pl.reciprocal(denom, approx=False)        # (TL, S) f32

        # V[l, d] = sum_s A[l, s] * v[s, d]; probs cast to v dtype for the MXU.
        oh = jnp.dot(attn.astype(vh.dtype), vh,
                     preferred_element_type=jnp.float32)     # (TL, D)
        o_ref[0, :, h * d_dim:(h + 1) * d_dim] = oh.astype(o_ref.dtype)

        if a_ref is not None:
            a_ref[0, h] = attn.astype(a_ref.dtype)


def full_attention(queries, keys, values, attn_mask=None, *,
                   mask_flag=True, scale=None, output_attention=False):
    """Pallas TPU implementation of FullAttention.forward (eval mode).

    queries: (B, L, H, E)  keys: (B, S, H, E)  values: (B, S, H, D)
    Returns (V, A) with V: (B, L, H, D) and A: (B, H, L, S) or None.
    """
    assert attn_mask is None  # only the default causal mask path is supported

    B, L, H, E = queries.shape
    _, S, _, D = values.shape
    scale_val = float(scale) if scale is not None else 1.0 / math.sqrt(E)

    # Free reshapes (contiguous trailing dims): lane-dense (B, L, H*E) slabs.
    q = queries.reshape(B, L, H * E)
    k = keys.reshape(B, S, H * E)
    v = values.reshape(B, S, H * D)

    # Tile the query axis; K/V are reused across L tiles.
    tile_l = L if L <= 256 else 256
    n_l = pl.cdiv(L, tile_l)

    kernel = partial(_attention_kernel, scale=scale_val, mask_flag=mask_flag,
                     heads=H, e_dim=E, d_dim=D)

    out_shapes = [jax.ShapeDtypeStruct((B, L, H * D), queries.dtype)]
    out_specs = [pl.BlockSpec((1, tile_l, H * D), lambda b, i: (b, i, 0))]
    if output_attention:
        out_shapes.append(jax.ShapeDtypeStruct((B, H, L, S), jnp.float32))
        out_specs.append(pl.BlockSpec((1, H, tile_l, S),
                                      lambda b, i: (b, 0, i, 0)))

    # VMEM budget: double-buffered q/k/v/out blocks + f32 per-head scratch.
    itemsize = jnp.dtype(queries.dtype).itemsize
    block_bytes = (2 * (tile_l * H * E + S * H * E + S * H * D + tile_l * H * D)
                   * itemsize + 4 * tile_l * S * 4)
    if output_attention:
        block_bytes += 2 * H * tile_l * S * 4
    vmem_limit = int(min(max(2 * block_bytes, 32 * 1024 * 1024),
                         64 * 1024 * 1024))

    bytes_accessed = (q.size + k.size + v.size + B * L * H * D) * itemsize
    if output_attention:
        bytes_accessed += B * H * L * S * 4
    cost = pl.CostEstimate(flops=2 * B * H * L * S * (E + D),
                           transcendentals=B * H * L * S,
                           bytes_accessed=int(bytes_accessed))

    results = pl.pallas_call(
        kernel,
        out_shape=tuple(out_shapes),
        grid_spec=pltpu.PrefetchScalarGridSpec(
            num_scalar_prefetch=0,
            grid=(B, n_l),
            in_specs=[
                pl.BlockSpec((1, tile_l, H * E), lambda b, i: (b, i, 0)),
                pl.BlockSpec((1, S, H * E), lambda b, i: (b, 0, 0)),
                pl.BlockSpec((1, S, H * D), lambda b, i: (b, 0, 0)),
            ],
            out_specs=tuple(out_specs),
        ),
        compiler_params=pltpu.CompilerParams(
            dimension_semantics=("parallel", "parallel"),
            vmem_limit_bytes=vmem_limit),
        cost_estimate=cost,
    )(q, k, v)

    V = results[0].reshape(B, L, H, D)
    if output_attention:
        return V, results[1]
    return V, None


def _reference(queries, keys, values, *, mask_flag=True, scale=None):
    """Pure-JAX reference mirroring the PyTorch forward (eval mode)."""
    B, L, H, E = queries.shape
    _, S, _, D = values.shape
    scale_val = scale if scale is not None else 1.0 / math.sqrt(E)
    scores = jnp.einsum('blhe,bshe->bhls', queries, keys).astype(jnp.float32)
    if mask_flag:
        causal = jnp.triu(jnp.ones((L, S), dtype=bool), k=1)
        scores = jnp.where(causal[None, None], -jnp.inf, scores)
    A = jax.nn.softmax(scale_val * scores, axis=-1)
    V = jnp.einsum('bhls,bshd->blhd', A, values.astype(jnp.float32))
    return V.astype(queries.dtype), A


if __name__ == "__main__":
    key = jax.random.PRNGKey(0)
    B, L, S, H, E, D = 2, 8, 8, 4, 32, 32
    kq, kk, kv = jax.random.split(key, 3)
    queries = jax.random.normal(kq, (B, L, H, E), dtype=jnp.float32)
    keys = jax.random.normal(kk, (B, S, H, E), dtype=jnp.float32)
    values = jax.random.normal(kv, (B, S, H, D), dtype=jnp.float32)

    # Path 1: attention weights requested (exact f32 A output).
    V, A = full_attention(queries, keys, values, attn_mask=None,
                          mask_flag=True, scale=None, output_attention=True)
    V = jax.block_until_ready(V)
    A = jax.block_until_ready(A)

    V_ref, A_ref = _reference(queries, keys, values, mask_flag=True, scale=None)
    assert V.shape == (B, L, H, D) and A.shape == (B, H, L, S)
    assert jnp.allclose(V, V_ref, atol=1e-5, rtol=1e-5)
    assert jnp.allclose(A, A_ref, atol=1e-5, rtol=1e-5)

    # Path 2: common inference path (no attention matrix materialized at all).
    V2, A2 = full_attention(queries, keys, values, attn_mask=None,
                            mask_flag=True, scale=None, output_attention=False)
    V2 = jax.block_until_ready(V2)
    assert A2 is None
    assert jnp.allclose(V2, V_ref, atol=1e-5, rtol=1e-5)

    # Path 3: non-masked branch.
    V3, _ = full_attention(queries, keys, values, attn_mask=None,
                           mask_flag=False, scale=None, output_attention=False)
    V3 = jax.block_until_ready(V3)
    V3_ref, _ = _reference(queries, keys, values, mask_flag=False, scale=None)
    assert jnp.allclose(V3, V3_ref, atol=1e-5, rtol=1e-5)

    print("KERNEL_OK")
</pallas_src>

<mosaic_0001>
module attributes {stable_mosaic.version = 11 : i64} {
  func.func @_attention_kernel(%arg0: i32, %arg1: i32, %arg2: memref<1x8x128xf32, #tpu.memory_space<vmem>>, %arg3: memref<1x8x128xf32, #tpu.memory_space<vmem>>, %arg4: memref<1x8x128xf32, #tpu.memory_space<vmem>>, %arg5: memref<1x8x128xf32, #tpu.memory_space<vmem>>, %arg6: memref<1x4x8x8xf32, #tpu.memory_space<vmem>>) attributes {dimension_semantics = [#tpu.dimension_semantics<parallel>, #tpu.dimension_semantics<parallel>], iteration_bounds = array<i64: 2, 1>, scalar_prefetch = 0 : i64, scratch_operands = 0 : i64, tpu.core_type = #tpu.core_type<tc>, window_params = [{transform_indices = @transform_0, window_bounds = array<i64: 1, 8, 128>}, {transform_indices = @transform_1, window_bounds = array<i64: 1, 8, 128>}, {transform_indices = @transform_2, window_bounds = array<i64: 1, 8, 128>}, {transform_indices = @transform_3, window_bounds = array<i64: 1, 8, 128>}, {transform_indices = @transform_4, window_bounds = array<i64: 1, 4, 8, 8>}]} {
    %c8_i32 = arith.constant 8 : i32
    %0 = arith.muli %arg1, %c8_i32 : i32
    %1 = tpu.iota {dimensions = array<i32: 0>} : vector<8x8xi32>
    %2 = vector.broadcast %0 : i32 to vector<8x8xi32>
    %3 = arith.addi %2, %1 : vector<8x8xi32>
    %4 = tpu.iota {dimensions = array<i32: 1>} : vector<8x8xi32>
    %5 = arith.cmpi sgt, %4, %3 : vector<8x8xi32>
    %c0 = arith.constant 0 : index
    %c0_0 = arith.constant 0 : index
    %c0_1 = arith.constant 0 : index
    %6 = vector.load %arg2[%c0, %c0_0, %c0_1] : memref<1x8x128xf32, #tpu.memory_space<vmem>>, vector<1x8x32xf32>
    %7 = vector.shape_cast %6 : vector<1x8x32xf32> to vector<8x32xf32>
    %c0_2 = arith.constant 0 : index
    %c0_3 = arith.constant 0 : index
    %c0_4 = arith.constant 0 : index
    %8 = vector.load %arg3[%c0_2, %c0_3, %c0_4] : memref<1x8x128xf32, #tpu.memory_space<vmem>>, vector<1x8x32xf32>
    %9 = vector.shape_cast %8 : vector<1x8x32xf32> to vector<8x32xf32>
    %c0_5 = arith.constant 0 : index
    %c0_6 = arith.constant 0 : index
    %c0_7 = arith.constant 0 : index
    %10 = vector.load %arg4[%c0_5, %c0_6, %c0_7] : memref<1x8x128xf32, #tpu.memory_space<vmem>>, vector<1x8x32xf32>
    %11 = vector.shape_cast %10 : vector<1x8x32xf32> to vector<8x32xf32>
    %cst = arith.constant 0.176776692 : f32
    %12 = vector.broadcast %cst : f32 to vector<8x32xf32>
    %13 = arith.mulf %7, %12 : vector<8x32xf32>
    %cst_8 = arith.constant dense<0.000000e+00> : vector<8x8xf32>
    %14 = tpu.matmul %13, %9, %cst_8 {dimension_numbers = #tpu.dot_dimension_numbers<[1], [1], [0], [0], [0, 0, 1, 0], [], []>} : vector<8x32xf32>, vector<8x32xf32>, vector<8x8xf32> -> vector<8x8xf32>
    %cst_9 = arith.constant -1.000000e+30 : f32
    %15 = vector.broadcast %cst_9 : f32 to vector<8x8xf32>
    %16 = arith.select %5, %15, %14 : vector<8x8xi1>, vector<8x8xf32>
    %cst_10 = arith.constant dense<0xFF800000> : vector<8xf32>
    %17 = vector.multi_reduction <maximumf>, %16, %cst_10 [1] : vector<8x8xf32> to vector<8xf32>
    %18 = vector.shape_cast %17 : vector<8xf32> to vector<8x1xf32>
    %19 = vector.broadcast %18 : vector<8x1xf32> to vector<8x8xf32>
    %20 = arith.subf %16, %19 : vector<8x8xf32>
    %21 = math.exp %20 : vector<8x8xf32>
    %cst_11 = arith.constant dense<0.000000e+00> : vector<8xf32>
    %22 = vector.multi_reduction <add>, %21, %cst_11 [1] : vector<8x8xf32> to vector<8xf32>
    %23 = vector.shape_cast %22 : vector<8xf32> to vector<8x1xf32>
    %24 = tpu.reciprocal %23 : vector<8x1xf32> -> vector<8x1xf32>
    %25 = vector.broadcast %24 : vector<8x1xf32> to vector<8x8xf32>
    %26 = arith.mulf %21, %25 : vector<8x8xf32>
    %cst_12 = arith.constant dense<0.000000e+00> : vector<8x32xf32>
    %27 = tpu.matmul %26, %11, %cst_12 {dimension_numbers = #tpu.dot_dimension_numbers<[1], [0], [0], [1], [0, 0, 1, 1], [], []>} : vector<8x8xf32>, vector<8x32xf32>, vector<8x32xf32> -> vector<8x32xf32>
    %c0_13 = arith.constant 0 : index
    %c0_14 = arith.constant 0 : index
    %c0_15 = arith.constant 0 : index
    %28 = vector.load %arg5[%c0_13, %c0_14, %c0_15] : memref<1x8x128xf32, #tpu.memory_space<vmem>>, vector<1x8x32xf32>
    %29 = vector.shape_cast %28 : vector<1x8x32xf32> to vector<8x32xf32>
    %30 = vector.shape_cast %27 : vector<8x32xf32> to vector<1x8x32xf32>
    tpu.vector_store %arg5[%c0_13, %c0_14, %c0_15], %30 {strides = array<i32>} : memref<1x8x128xf32, #tpu.memory_space<vmem>>, vector<1x8x32xf32>,
    %c0_16 = arith.constant 0 : index
    %c0_17 = arith.constant 0 : index
    %c0_18 = arith.constant 0 : index
    %c0_19 = arith.constant 0 : index
    %31 = vector.load %arg6[%c0_16, %c0_17, %c0_18, %c0_19] : memref<1x4x8x8xf32, #tpu.memory_space<vmem>>, vector<1x1x8x8xf32>
    %32 = vector.shape_cast %31 : vector<1x1x8x8xf32> to vector<8x8xf32>
    %33 = vector.shape_cast %26 : vector<8x8xf32> to vector<1x1x8x8xf32>
    tpu.vector_store %arg6[%c0_16, %c0_17, %c0_18, %c0_19], %33 {strides = array<i32>} : memref<1x4x8x8xf32, #tpu.memory_space<vmem>>, vector<1x1x8x8xf32>,
    %c0_20 = arith.constant 0 : index
    %c0_21 = arith.constant 0 : index
    %c32 = arith.constant 32 : index
    %34 = vector.load %arg2[%c0_20, %c0_21, %c32] : memref<1x8x128xf32, #tpu.memory_space<vmem>>, vector<1x8x32xf32>
    %35 = vector.shape_cast %34 : vector<1x8x32xf32> to vector<8x32xf32>
    %c0_22 = arith.constant 0 : index
    %c0_23 = arith.constant 0 : index
    %c32_24 = arith.constant 32 : index
    %36 = vector.load %arg3[%c0_22, %c0_23, %c32_24] : memref<1x8x128xf32, #tpu.memory_space<vmem>>, vector<1x8x32xf32>
    %37 = vector.shape_cast %36 : vector<1x8x32xf32> to vector<8x32xf32>
    %c0_25 = arith.constant 0 : index
    %c0_26 = arith.constant 0 : index
    %c32_27 = arith.constant 32 : index
    %38 = vector.load %arg4[%c0_25, %c0_26, %c32_27] : memref<1x8x128xf32, #tpu.memory_space<vmem>>, vector<1x8x32xf32>
    %39 = vector.shape_cast %38 : vector<1x8x32xf32> to vector<8x32xf32>
    %cst_28 = arith.constant 0.176776692 : f32
    %40 = vector.broadcast %cst_28 : f32 to vector<8x32xf32>
    %41 = arith.mulf %35, %40 : vector<8x32xf32>
    %cst_29 = arith.constant dense<0.000000e+00> : vector<8x8xf32>
    %42 = tpu.matmul %41, %37, %cst_29 {dimension_numbers = #tpu.dot_dimension_numbers<[1], [1], [0], [0], [0, 0, 1, 0], [], []>} : vector<8x32xf32>, vector<8x32xf32>, vector<8x8xf32> -> vector<8x8xf32>
    %cst_30 = arith.constant -1.000000e+30 : f32
    %43 = vector.broadcast %cst_30 : f32 to vector<8x8xf32>
    %44 = arith.select %5, %43, %42 : vector<8x8xi1>, vector<8x8xf32>
    %cst_31 = arith.constant dense<0xFF800000> : vector<8xf32>
    %45 = vector.multi_reduction <maximumf>, %44, %cst_31 [1] : vector<8x8xf32> to vector<8xf32>
    %46 = vector.shape_cast %45 : vector<8xf32> to vector<8x1xf32>
    %47 = vector.broadcast %46 : vector<8x1xf32> to vector<8x8xf32>
    %48 = arith.subf %44, %47 : vector<8x8xf32>
    %49 = math.exp %48 : vector<8x8xf32>
    %cst_32 = arith.constant dense<0.000000e+00> : vector<8xf32>
    %50 = vector.multi_reduction <add>, %49, %cst_32 [1] : vector<8x8xf32> to vector<8xf32>
    %51 = vector.shape_cast %50 : vector<8xf32> to vector<8x1xf32>
    %52 = tpu.reciprocal %51 : vector<8x1xf32> -> vector<8x1xf32>
    %53 = vector.broadcast %52 : vector<8x1xf32> to vector<8x8xf32>
    %54 = arith.mulf %49, %53 : vector<8x8xf32>
    %cst_33 = arith.constant dense<0.000000e+00> : vector<8x32xf32>
    %55 = tpu.matmul %54, %39, %cst_33 {dimension_numbers = #tpu.dot_dimension_numbers<[1], [0], [0], [1], [0, 0, 1, 1], [], []>} : vector<8x8xf32>, vector<8x32xf32>, vector<8x32xf32> -> vector<8x32xf32>
    %c0_34 = arith.constant 0 : index
    %c0_35 = arith.constant 0 : index
    %c32_36 = arith.constant 32 : index
    %56 = vector.load %arg5[%c0_34, %c0_35, %c32_36] : memref<1x8x128xf32, #tpu.memory_space<vmem>>, vector<1x8x32xf32>
    %57 = vector.shape_cast %56 : vector<1x8x32xf32> to vector<8x32xf32>
    %58 = vector.shape_cast %55 : vector<8x32xf32> to vector<1x8x32xf32>
    tpu.vector_store %arg5[%c0_34, %c0_35, %c32_36], %58 {strides = array<i32>} : memref<1x8x128xf32, #tpu.memory_space<vmem>>, vector<1x8x32xf32>,
    %c0_37 = arith.constant 0 : index
    %c1 = arith.constant 1 : index
    %c0_38 = arith.constant 0 : index
    %c0_39 = arith.constant 0 : index
    %59 = vector.load %arg6[%c0_37, %c1, %c0_38, %c0_39] : memref<1x4x8x8xf32, #tpu.memory_space<vmem>>, vector<1x1x8x8xf32>
    %60 = vector.shape_cast %59 : vector<1x1x8x8xf32> to vector<8x8xf32>
    %61 = vector.shape_cast %54 : vector<8x8xf32> to vector<1x1x8x8xf32>
    tpu.vector_store %arg6[%c0_37, %c1, %c0_38, %c0_39], %61 {strides = array<i32>} : memref<1x4x8x8xf32, #tpu.memory_space<vmem>>, vector<1x1x8x8xf32>,
    %c0_40 = arith.constant 0 : index
    %c0_41 = arith.constant 0 : index
    %c64 = arith.constant 64 : index
    %62 = vector.load %arg2[%c0_40, %c0_41, %c64] : memref<1x8x128xf32, #tpu.memory_space<vmem>>, vector<1x8x32xf32>
    %63 = vector.shape_cast %62 : vector<1x8x32xf32> to vector<8x32xf32>
    %c0_42 = arith.constant 0 : index
    %c0_43 = arith.constant 0 : index
    %c64_44 = arith.constant 64 : index
    %64 = vector.load %arg3[%c0_42, %c0_43, %c64_44] : memref<1x8x128xf32, #tpu.memory_space<vmem>>, vector<1x8x32xf32>
    %65 = vector.shape_cast %64 : vector<1x8x32xf32> to vector<8x32xf32>
    %c0_45 = arith.constant 0 : index
    %c0_46 = arith.constant 0 : index
    %c64_47 = arith.constant 64 : index
    %66 = vector.load %arg4[%c0_45, %c0_46, %c64_47] : memref<1x8x128xf32, #tpu.memory_space<vmem>>, vector<1x8x32xf32>
    %67 = vector.shape_cast %66 : vector<1x8x32xf32> to vector<8x32xf32>
    %cst_48 = arith.constant 0.176776692 : f32
    %68 = vector.broadcast %cst_48 : f32 to vector<8x32xf32>
    %69 = arith.mulf %63, %68 : vector<8x32xf32>
    %cst_49 = arith.constant dense<0.000000e+00> : vector<8x8xf32>
    %70 = tpu.matmul %69, %65, %cst_49 {dimension_numbers = #tpu.dot_dimension_numbers<[1], [1], [0], [0], [0, 0, 1, 0], [], []>} : vector<8x32xf32>, vector<8x32xf32>, vector<8x8xf32> -> vector<8x8xf32>
    %cst_50 = arith.constant -1.000000e+30 : f32
    %71 = vector.broadcast %cst_50 : f32 to vector<8x8xf32>
    %72 = arith.select %5, %71, %70 : vector<8x8xi1>, vector<8x8xf32>
    %cst_51 = arith.constant dense<0xFF800000> : vector<8xf32>
    %73 = vector.multi_reduction <maximumf>, %72, %cst_51 [1] : vector<8x8xf32> to vector<8xf32>
    %74 = vector.shape_cast %73 : vector<8xf32> to vector<8x1xf32>
    %75 = vector.broadcast %74 : vector<8x1xf32> to vector<8x8xf32>
    %76 = arith.subf %72, %75 : vector<8x8xf32>
    %77 = math.exp %76 : vector<8x8xf32>
    %cst_52 = arith.constant dense<0.000000e+00> : vector<8xf32>
    %78 = vector.multi_reduction <add>, %77, %cst_52 [1] : vector<8x8xf32> to vector<8xf32>
    %79 = vector.shape_cast %78 : vector<8xf32> to vector<8x1xf32>
    %80 = tpu.reciprocal %79 : vector<8x1xf32> -> vector<8x1xf32>
    %81 = vector.broadcast %80 : vector<8x1xf32> to vector<8x8xf32>
    %82 = arith.mulf %77, %81 : vector<8x8xf32>
    %cst_53 = arith.constant dense<0.000000e+00> : vector<8x32xf32>
    %83 = tpu.matmul %82, %67, %cst_53 {dimension_numbers = #tpu.dot_dimension_numbers<[1], [0], [0], [1], [0, 0, 1, 1], [], []>} : vector<8x8xf32>, vector<8x32xf32>, vector<8x32xf32> -> vector<8x32xf32>
    %c0_54 = arith.constant 0 : index
    %c0_55 = arith.constant 0 : index
    %c64_56 = arith.constant 64 : index
    %84 = vector.load %arg5[%c0_54, %c0_55, %c64_56] : memref<1x8x128xf32, #tpu.memory_space<vmem>>, vector<1x8x32xf32>
    %85 = vector.shape_cast %84 : vector<1x8x32xf32> to vector<8x32xf32>
    %86 = vector.shape_cast %83 : vector<8x32xf32> to vector<1x8x32xf32>
    tpu.vector_store %arg5[%c0_54, %c0_55, %c64_56], %86 {strides = array<i32>} : memref<1x8x128xf32, #tpu.memory_space<vmem>>, vector<1x8x32xf32>,
    %c0_57 = arith.constant 0 : index
    %c2 = arith.constant 2 : index
    %c0_58 = arith.constant 0 : index
    %c0_59 = arith.constant 0 : index
    %87 = vector.load %arg6[%c0_57, %c2, %c0_58, %c0_59] : memref<1x4x8x8xf32, #tpu.memory_space<vmem>>, vector<1x1x8x8xf32>
    %88 = vector.shape_cast %87 : vector<1x1x8x8xf32> to vector<8x8xf32>
    %89 = vector.shape_cast %82 : vector<8x8xf32> to vector<1x1x8x8xf32>
    tpu.vector_store %arg6[%c0_57, %c2, %c0_58, %c0_59], %89 {strides = array<i32>} : memref<1x4x8x8xf32, #tpu.memory_space<vmem>>, vector<1x1x8x8xf32>,
    %c0_60 = arith.constant 0 : index
    %c0_61 = arith.constant 0 : index
    %c96 = arith.constant 96 : index
    %90 = vector.load %arg2[%c0_60, %c0_61, %c96] : memref<1x8x128xf32, #tpu.memory_space<vmem>>, vector<1x8x32xf32>
    %91 = vector.shape_cast %90 : vector<1x8x32xf32> to vector<8x32xf32>
    %c0_62 = arith.constant 0 : index
    %c0_63 = arith.constant 0 : index
    %c96_64 = arith.constant 96 : index
    %92 = vector.load %arg3[%c0_62, %c0_63, %c96_64] : memref<1x8x128xf32, #tpu.memory_space<vmem>>, vector<1x8x32xf32>
    %93 = vector.shape_cast %92 : vector<1x8x32xf32> to vector<8x32xf32>
    %c0_65 = arith.constant 0 : index
    %c0_66 = arith.constant 0 : index
    %c96_67 = arith.constant 96 : index
    %94 = vector.load %arg4[%c0_65, %c0_66, %c96_67] : memref<1x8x128xf32, #tpu.memory_space<vmem>>, vector<1x8x32xf32>
    %95 = vector.shape_cast %94 : vector<1x8x32xf32> to vector<8x32xf32>
    %cst_68 = arith.constant 0.176776692 : f32
    %96 = vector.broadcast %cst_68 : f32 to vector<8x32xf32>
    %97 = arith.mulf %91, %96 : vector<8x32xf32>
    %cst_69 = arith.constant dense<0.000000e+00> : vector<8x8xf32>
    %98 = tpu.matmul %97, %93, %cst_69 {dimension_numbers = #tpu.dot_dimension_numbers<[1], [1], [0], [0], [0, 0, 1, 0], [], []>} : vector<8x32xf32>, vector<8x32xf32>, vector<8x8xf32> -> vector<8x8xf32>
    %cst_70 = arith.constant -1.000000e+30 : f32
    %99 = vector.broadcast %cst_70 : f32 to vector<8x8xf32>
    %100 = arith.select %5, %99, %98 : vector<8x8xi1>, vector<8x8xf32>
    %cst_71 = arith.constant dense<0xFF800000> : vector<8xf32>
    %101 = vector.multi_reduction <maximumf>, %100, %cst_71 [1] : vector<8x8xf32> to vector<8xf32>
    %102 = vector.shape_cast %101 : vector<8xf32> to vector<8x1xf32>
    %103 = vector.broadcast %102 : vector<8x1xf32> to vector<8x8xf32>
    %104 = arith.subf %100, %103 : vector<8x8xf32>
    %105 = math.exp %104 : vector<8x8xf32>
    %cst_72 = arith.constant dense<0.000000e+00> : vector<8xf32>
    %106 = vector.multi_reduction <add>, %105, %cst_72 [1] : vector<8x8xf32> to vector<8xf32>
    %107 = vector.shape_cast %106 : vector<8xf32> to vector<8x1xf32>
    %108 = tpu.reciprocal %107 : vector<8x1xf32> -> vector<8x1xf32>
    %109 = vector.broadcast %108 : vector<8x1xf32> to vector<8x8xf32>
    %110 = arith.mulf %105, %109 : vector<8x8xf32>
    %cst_73 = arith.constant dense<0.000000e+00> : vector<8x32xf32>
    %111 = tpu.matmul %110, %95, %cst_73 {dimension_numbers = #tpu.dot_dimension_numbers<[1], [0], [0], [1], [0, 0, 1, 1], [], []>} : vector<8x8xf32>, vector<8x32xf32>, vector<8x32xf32> -> vector<8x32xf32>
    %c0_74 = arith.constant 0 : index
    %c0_75 = arith.constant 0 : index
    %c96_76 = arith.constant 96 : index
    %112 = vector.load %arg5[%c0_74, %c0_75, %c96_76] : memref<1x8x128xf32, #tpu.memory_space<vmem>>, vector<1x8x32xf32>
    %113 = vector.shape_cast %112 : vector<1x8x32xf32> to vector<8x32xf32>
    %114 = vector.shape_cast %111 : vector<8x32xf32> to vector<1x8x32xf32>
    tpu.vector_store %arg5[%c0_74, %c0_75, %c96_76], %114 {strides = array<i32>} : memref<1x8x128xf32, #tpu.memory_space<vmem>>, vector<1x8x32xf32>,
    %c0_77 = arith.constant 0 : index
    %c3 = arith.constant 3 : index
    %c0_78 = arith.constant 0 : index
    %c0_79 = arith.constant 0 : index
    %115 = vector.load %arg6[%c0_77, %c3, %c0_78, %c0_79] : memref<1x4x8x8xf32, #tpu.memory_space<vmem>>, vector<1x1x8x8xf32>
    %116 = vector.shape_cast %115 : vector<1x1x8x8xf32> to vector<8x8xf32>
    %117 = vector.shape_cast %110 : vector<8x8xf32> to vector<1x1x8x8xf32>
    tpu.vector_store %arg6[%c0_77, %c3, %c0_78, %c0_79], %117 {strides = array<i32>} : memref<1x4x8x8xf32, #tpu.memory_space<vmem>>, vector<1x1x8x8xf32>,
    return
  }
  func.func @transform_0(%arg0: i32, %arg1: i32) -> (i32, i32, i32) {
    %c0_i32 = arith.constant 0 : i32
    %c0_i32_0 = arith.constant 0 : i32
    return %arg0, %arg1, %c0_i32 : i32, i32, i32
  }
  func.func @transform_1(%arg0: i32, %arg1: i32) -> (i32, i32, i32) {
    %c0_i32 = arith.constant 0 : i32
    %c0_i32_0 = arith.constant 0 : i32
    %c0_i32_1 = arith.constant 0 : i32
    return %arg0, %c0_i32, %c0_i32_0 : i32, i32, i32
  }
  func.func @transform_2(%arg0: i32, %arg1: i32) -> (i32, i32, i32) {
    %c0_i32 = arith.constant 0 : i32
    %c0_i32_0 = arith.constant 0 : i32
    %c0_i32_1 = arith.constant 0 : i32
    return %arg0, %c0_i32, %c0_i32_0 : i32, i32, i32
  }
  func.func @transform_3(%arg0: i32, %arg1: i32) -> (i32, i32, i32) {
    %c0_i32 = arith.constant 0 : i32
    %c0_i32_0 = arith.constant 0 : i32
    return %arg0, %arg1, %c0_i32 : i32, i32, i32
  }
  func.func @transform_4(%arg0: i32, %arg1: i32) -> (i32, i32, i32, i32) {
    %c0_i32 = arith.constant 0 : i32
    %c0_i32_0 = arith.constant 0 : i32
    %c0_i32_1 = arith.constant 0 : i32
    return %arg0, %c0_i32, %arg1, %c0_i32_0 : i32, i32, i32, i32
  }
}

</mosaic_0001>

<bundles_post_ra>
// kernel: tpu_custom_call.1
= control target key start
LH: loop header
LB: loop body
LE: loop exit
PB: predicated region body
PF: predicated region fallthrough
CT: control target
= control target key end

     0   :  { %s1516_s0 = inlined_call_operand.hbm [shape: f32[2,8,128], index: 0, kind: input, shape index: {}]   ;;  %s1517_s1 = inlined_call_operand.hbm [shape: f32[2,8,128], index: 1, kind: input, shape index: {}]   ;;  %s1518_s2 = inlined_call_operand.hbm [shape: f32[2,8,128], index: 2, kind: input, shape index: {}]   ;;  %s1519_s3 = inlined_call_operand.hbm [shape: f32[2,8,128], index: 3, kind: output, shape index: {0}]   ;;  %s1520_s4 = inlined_call_operand.hbm [shape: f32[2,4,8,8], index: 4, kind: output, shape index: {1}]  }
   0x1   :  { %1524 = sst [smem:[#allocation19_spill]] %s1517_s1 }
   0x2   :  { %10 = vsyncpa [#allocation3], 0 }
   0x3   :  { %12 = vsyncpa [#allocation3 + $0x1], 0 }
   0x4   :  { %13 = vsyncpa [#allocation6], 0 }
   0x5   :  { %15 = vsyncpa [#allocation6 + $0x1], 0 }
   0x6   :  { %16 = vsyncpa [#allocation4], 0 }
   0x7   :  { %18 = vsyncpa [#allocation4 + $0x1], 0 }
   0x8   :  { %19 = vsyncpa [#allocation10], 0 }
   0x9   :  { %21 = vsyncpa [#allocation10 + $0x1], 0  ;;  %s1267_s15 = smov 0   ;;  %s1269_s16 = smov 0  }
   0xa   :  { %s1271_s17 = smov 0   ;;  %s1273_s18 = smov 0  }
   0xb   :  { %s1275_s19 = smov 0   ;;  %s1277_s20 = smov 0  }
   0xc LB: > { %1525 = sst [smem:[#allocation15_spill]] %s1223_s17  ;;  %s1298_s21 = sadd.s32 4294967295, %s1235_s20   ;;  %s1235_s20 = sphi %s1277_s20, %s27_s20   ;;  %s1231_s19 = sphi %s1275_s19, %s1539_s19   ;;  %s1227_s18 = sphi %s1273_s18, %s1538_s18   ;;  %s1223_s17 = sphi %s1271_s17, %s1537_s17   ;;  %s1219_s16 = sphi %s1269_s16, %s1541_s16   ;;  %s1215_s15 = sphi %s1267_s15, %s1540_s15  }
   0xd   : > { %1526 = sst [smem:[#allocation16_spill]] %s1231_s19  ;;  %s891_s22 = sadd.s32 4294967294, %s1235_s20  }
   0xe   : > { %s39_s23 = sadd.s32 1, %s1231_s19  ;;  %s48_s24 = sadd.s32 1, %s1223_s17 }
   0xf   : > { %p41_p0 = scmp.ge.s32.totalorder %s39_s23, 2  ;;  %p55_p1 = scmp.ne.s32.totalorder %s1223_s17, %s1219_s16 }
  0x10   : > { %p56_p2 = scmp.eq.s32.totalorder %s1235_s20, 0  ;;  %p61_p3 = scmp.ne.s32.totalorder %s1219_s16, %s1215_s15 }
  0x11   : > { %s1543_s23 = smov (%p41_p0, %s39_s23), 0  ;;  %p62_p5 = scmp.eq.s32.totalorder %s1298_s21, 0 }
  0x12   : > { %1527 = sst [smem:[#allocation17_spill]] %s1543_s23  ;;  %p1310_p4 = por %p56_p2, %p55_p1 }
  0x13   : > { %s43_s26 = ssub.s32 %s1231_s19, %s1543_s23  ;;  %p139_p6 = scmp.eq.s32.totalorder %s1298_s21, 1 }
  0x14   : > { %p46_p7 = scmp.eq.s32.totalorder %s43_s26, 0  ;;  %p1318_p8 = por %p62_p5, %p61_p3 }
  0x15   : > { %p1322_p9 = por %p139_p6, %p55_p1  ;;  %p145_p10 = scmp.eq.s32.totalorder %s891_s22, 1 }
  0x16   : > { %s1327_s29 = scalar_select %p46_p7, %s1223_s17, %s48_s24  }
  0x17   : > { %p1329_p11 = por %p145_p10, %p61_p3  ;;  %p893_p12 = scmp.ge.s32.totalorder %s1235_s20, 2 }
  0x18   : > { %1531 = sst [smem:[#allocation18_spill]] %s1327_s29  ;;  %p956_p13 = scmp.lt.s32.totalorder %s1235_s20, 2 }
  0x19   : > { %s193_s5 = sand.u32 1, %s1223_s17   ;;  %s895_s7 = sshll.u32 %s1231_s19, 3 }
  0x1a   : > { %s894_s6 = sshll.u32 %s193_s5, 3  ;;  %p1339_p0 = pnand %p956_p13, %p1310_p4 }
  0x1b   : > { %s213_s9 = sand.u32 1, %s1235_s20   ;;  %s1534_s1 = sld [smem:[#allocation19_spill]] }
  0x1c   : > { %s217_s14 = scalar_lea.vmem [#allocation5], %s894_s6  ;;  %s214_s24 = scalar_lea.sflag [#allocation6], %s213_s9 }
  0x1d   : > { %s225_s22 = sshll.u32 %s217_s14, 4  ;;  %p900_p1 = scmp.ge.s32.totalorder %s1235_s20, 1  ;;  %s226_s22 = int_to_ptr.vmem [resolvable:$true] %s225_s22 }
  0x1e   : > { %p249_p2 = scmp.lt.s32.totalorder %s1235_s20, 3  ;;  %s202_s10 = scalar_lea.hbm %s1516_s0, %s895_s7 }
  0x1f   : > { %s204_s11 = sshll.u32 %s202_s10, 4  ;;  %s194_s14 = scalar_lea.sflag [#allocation3], %s193_s5  ;;  %s205_s11 = int_to_ptr.hbm [resolvable:$true] %s204_s11 }
  0x20   : > { %p1351_p3 = pnand %p900_p1, %p249_p2  ;;  %s236_s29 = scalar_lea.vmem [#allocation7], %s894_s6 }
  0x21   : > { %s221_s12 = scalar_lea.hbm %s1534_s1, %s895_s7  ;;  %s244_s17 = sshll.u32 %s236_s29, 4  ;;  %s245_s17 = int_to_ptr.vmem [resolvable:$true] %s244_s17 }
  0x22   : > { %s223_s13 = sshll.u32 %s221_s12, 4  ;;  %s197_s12 = scalar_lea.vmem [#allocation2], %s894_s6  ;;  %s224_s13 = int_to_ptr.hbm [resolvable:$true] %s223_s13 }
  0x23   : > { %945 = dma.hbm_to_vmem [thread:$0]  (!%p1339_p0), %s224_s13, 128, %s226_s22, %s214_s24  }
  0x24   : > { %s206_s1 = sshll.u32 %s197_s12, 4  ;;  %s240_s22 = scalar_lea.hbm %s1518_s2, %s895_s7  ;;  %s207_s1 = int_to_ptr.vmem [resolvable:$true] %s206_s1 }
  0x25   : > { %942 = dma.hbm_to_vmem [thread:$0]  (!%p1339_p0), %s205_s11, 128, %s207_s1, %s194_s14  }
  0x26   : > { %s242_s19 = sshll.u32 %s240_s22, 4  ;;  %253 = sbr.rel (%p1351_p3) target bundleno = 1092 (0x444), region = 32  ;;  %s243_s19 = int_to_ptr.hbm [resolvable:$true] %s242_s19 }
  0x27   : > { %948 = dma.hbm_to_vmem [thread:$0]  (!%p1339_p0), %s243_s19, 128, %s245_s17, %s214_s24  }
  0x28   : > { %s1368_s23 = sand.u32 (!%p1351_p3), 1, %s1219_s16  }
  0x29   : > { %s1371_s1 = sshll.u32 (!%p1351_p3), %s1368_s23, 3  ;;  %s256_s5 = scalar_lea.sflag (!%p1351_p3), [#allocation3], %s1368_s23 }
  0x2a   : > { %s259_s7 = scalar_lea.vmem (!%p1351_p3), [#allocation2], %s1371_s1 }
  0x2b   : > { %1198 = dma.done.wait (%p1318_p8), %s256_s5, 128  }
  0x2c   : > { %1200 = vsyncadd (%p1318_p8), %s256_s5, 4294967168  ;;  %s265_s17 = sand.u32 1, %s1298_s21   ;;  %s269_s29 = scalar_lea.vmem [#allocation5], %s1371_s1 }
  0x2d   : > { %s266_s19 = scalar_lea.sflag [#allocation6], %s265_s17 }
  0x2e   : > { %1202 = dma.done.wait (%p1318_p8), %s266_s19, 256  }
  0x2f   : > { %1204 = vsyncadd (%p1318_p8), %s266_s19, 4294967040  ;;  %vm332_vm0 = vcmask 261120   ;;  %v329_v0 = vld [vmem:[%s269_s29] sm:$0xff]  ;;  %v328_v1 = vld [vmem:[%s259_s7] sm:$0xff]  ;;  %s1237_s6 = smov 96   ;;  %s1238_s8 = smov 64   ;;  %v321_v4 = vlaneseq }
  0x30   : > { %906 = vmatpush.xpose.msk.msra.mxu0 %vm332_vm0, %v329_v0  ;;  %v331_v2 = vmul.f32 0.17677669, %v328_v1  ;;  %418 = vrot.lane.b32.xlu1 %v329_v0, %s1237_s6  ;;  %s1239_s21 = smov 32   ;;  %vm360_vm2 = vcmask 64512   ;;  %s279_s27 = scalar_lea.vmem [#allocation7], %s1371_s1 }
  0x31   : > { %512 = vrot.lane.b32.xlu2 %v329_v0, %s1238_s8  ;;  %v1393_v5 = vshrl.u32 %v321_v4, 7  ;;  %v1395_v6 = vand.u32 127, %v321_v4  ;;  %v1413_v22 = vld [vmem:[%s279_s27] sm:$0xff]  ;;  %s905_s24 = sshll.u32 %s1368_s23, 5  ;;  %s1432_s26 = scalar_lea.vmem [#allocation8], %s1371_s1 }
  0x32   : > { %403 = vmatpush.msra.mxu1 %v1413_v22  ;;  %s1426_s25 = scalar_lea.vmem [#allocation9], %s905_s24  ;;  %s928_s10 = sshll.u32 %s1227_s18, 5 }
  0x33   : > { %907 = vmatmul.msk.f32.vlgmr.msra.gmra.mxu0 %vm332_vm0, %v331_v2  ;;  %vm327_vm1 = vcmp.gt.s32.totalorder %v1395_v6, %v1393_v5  ;;  %s726_s11 = sshll.u32 %s1426_s25, 4  ;;  %s725_s9 = scalar_lea.hbm %s1520_s4, %s928_s10  ;;  %s727_s11 = int_to_ptr.vmem [resolvable:$true] %s726_s11 }
  0x34   : > { %s728_s13 = sshll.u32 %s725_s9, 4  ;;  %s698_s22 = scalar_lea.sflag [#allocation10], %s1368_s23  ;;  %s729_s13 = int_to_ptr.hbm [resolvable:$true] %s728_s13 }
  0x35   : > { %s1131_s1 = sshra.s32 %s729_s13, 4  ;;  %s1137_s19 = scalar_lea.hbm %s1520_s4, 64  ;;  %s1132_s1 = int_to_ptr.hbm [resolvable:$true] %s1131_s1 }
  0x36   : > { %s1133_s5 = scalar_lea.hbm %s1132_s1, 32  ;;  %p1138_p7 = scmp.lt.s32.totalorder %s1132_s1, %s1520_s4 }
  0x37   : > { %p1134_p4 = scmp.ne.s32.totalorder %s1132_s1, %s1133_s5  ;;  %p1139_p8 = scmp.lt.s32.totalorder %s1137_s19, %s1133_s5 }
  0x38   : > { %415 = vrot.lane.b32.xlu1 %v331_v2, %s1237_s6 }
  0x39   : > { %606 = vrot.lane.b32.xlu2 %v329_v0, %s1239_s21  ;;  %p1135_p5 = pnand %p1134_p4, %p1322_p9  ;;  %p1140_p10 = por %p1139_p8, %p1138_p7 }
  0x3b   : > { %p1136_p6 = pneg %p1135_p5 }
  0x3d   : > { %p1141_p13 = pnand %p1140_p10, %p1136_p6 }
  0x40   : > { %603 = vrot.lane.b32.xlu1 %v331_v2, %s1239_s21 }
  0x8b   : > { %v513_v11 = vpop.permute.xlu2 %512 }
  0x8c   : > { %913 = vmatpush.xpose.msk.msrb.mxu1 %vm332_vm0, %v513_v11 }
  0x93   : > { %v607_v12 = vpop.permute.xlu2 %606 }
  0x94   : > { %917 = vmatpush.xpose.msk.msrb.mxu0 %vm332_vm0, %v607_v12 }
  0xa2   : > { %v419_v3 = vpop.permute.xlu1 %418 }
  0xa3   : > { %909 = vmatpush.xpose.msk.msra.mxu2 %vm332_vm0, %v419_v3 }
  0xaa   : > { %v416_v7 = vpop.permute.xlu1 %415 }
  0xab   : > { %910 = vmatmul.msk.f32.vlgmr.msra.gmra.mxu2 %vm332_vm0, %v416_v7 }
  0xb0   : > { %v356_v8 = vpop.f32.mrf.mxu0 }
  0xb1   : > { %v359_v9 = vsel %vm327_vm1, -1e+30, %v356_v8 }
  0xb2   : > { %v361_v10 = vsel %vm360_vm2, %v359_v9, -inf  ;;  %v604_v13 = vpop.permute.xlu1 %603 }
  0xb3   : > { %362 = vmax.xlane.f32.xlu0 %v361_v10  ;;  %918 = vmatmul.msk.f32.vlgmr.msrb.gmra.mxu0 %vm332_vm0, %v604_v13 }
 0x126   : > { %v363_v14 = vpop.xlane.xlu0 %362 }
 0x127   : > { %v364_v15 = vsub.f32 %v359_v9, %v363_v14 }
 0x129   : > { %v365_v16 = vmul.f32 1.442695, %v364_v15 }
 0x12b   : > { %1011 = vpow2.f32 %v365_v16 }
 0x12e   : > { %v441_v17 = vpop.f32.mrf.mxu2 }
 0x12f   : > { %v444_v18 = vsel %vm327_vm1, -1e+30, %v441_v17 }
 0x130   : > { %v445_v19 = vsel %vm360_vm2, %v444_v18, -inf  ;;  %v629_v23 = vpop.f32.mrf.mxu0 }
 0x131   : > { %v1012_v20 = vpop.eup %1011  ;;  %446 = vmax.xlane.f32.xlu2 %v445_v19  ;;  %v632_v24 = vsel %vm327_vm1, -1e+30, %v629_v23 }
 0x132   : > { %v367_v21 = vsel %vm360_vm2, %v1012_v20, 0.0  ;;  %v633_v25 = vsel %vm360_vm2, %v632_v24, -inf }
 0x133   : > { %368 = vadd.xlane.f32.xlu0 %v367_v21 }
 0x147   : > { %509 = vrot.lane.b32.xlu0 %v331_v2, %s1238_s8 }
 0x171   : > { %634 = vmax.xlane.f32.xlu0 %v633_v25 }
 0x185   : > { %658 = vrot.lane.b32.xlu0 %v1413_v22, %s1239_s21 }
 0x1a4   : > { %v447_v26 = vpop.xlane.xlu2 %446 }
 0x1a5   : > { %v448_v27 = vsub.f32 %v444_v18, %v447_v26 }
 0x1a6   : > { %v369_v28 = vpop.xlane.xlu0 %368 }
 0x1a7   : > { %1013 = vrcp.f32 %v369_v28  ;;  %v449_v29 = vmul.f32 1.442695, %v448_v27  ;;  %v381_v35 = vand.u32 2147483648, %v369_v28  ;;  %v379_v37 = vand.u32 2147483647, %v369_v28 }
 0x1a8   : > { %vm375_vm4 = vweird.f32 %v369_v28 }
 0x1a9   : > { %1015 = vpow2.f32 %v449_v29  ;;  %v382_v39 = vor.u32 1.1754944e-38, %v381_v35  ;;  %vm380_vm6 = vcmp.eq.f32.partialorder %v379_v37, 8.507059e+37 }
 0x1ad   : > { %v1014_v30 = vpop.eup %1013 }
 0x1ae   : > { %v371_v31 = vmul.f32 %v1014_v30, %v369_v28  ;;  %vm376_vm3 = vweird.f32 %v1014_v30 }
 0x1af   : > { %v1016_v32 = vpop.eup %1015  ;;  %vm377_vm5 = vmor %vm375_vm4, %vm376_vm3 }
 0x1b0   : > { %v372_v33 = vsub.f32 1.0, %v371_v31  ;;  %v451_v34 = vsel %vm360_vm2, %v1016_v32, 0.0 }
 0x1b1   : > { %452 = vadd.xlane.f32.xlu2 %v451_v34 }
 0x1b2   : > { %v373_v36 = vmul.f32 %v1014_v30, %v372_v33 }
 0x1b4   : > { %v374_v38 = vadd.f32 %v1014_v30, %v373_v36 }
 0x1b6   : > { %v378_v40 = vsel %vm377_vm5, %v1014_v30, %v374_v38 }
 0x1b7   : > { %v383_v41 = vsel %vm380_vm6, %v382_v39, %v378_v40 }
 0x1b8   : > { %v384_v42 = vmul.f32 %v1012_v20, %v383_v41 }
 0x1b9   : > { %v510_v43 = vpop.permute.xlu0 %509 }
 0x1ba   : > { %908 = vmatmul.msk.f32.vlgmr.msra.gmra.mxu1 %vm360_vm2, %v384_v42  ;;  %409 = vst.msk [vmem:[%s1426_s25] sm:$0xff] %vm360_vm2, %v384_v42 }
 0x1c2   : > { %914 = vmatmul.msk.f32.vlgmr.msrb.gmra.mxu1 %vm332_vm0, %v510_v43 }
 0x1e4   : > { %v635_v54 = vpop.xlane.xlu0 %634 }
 0x1e5   : > { %v636_v58 = vsub.f32 %v632_v24, %v635_v54 }
 0x1e7   : > { %v637_v59 = vmul.f32 1.442695, %v636_v58 }
 0x1f7   : > { %v659_v1 = vpop.permute.xlu0 %658 }
 0x1f8   : > { %679 = vmatpush.msrb.mxu2 %v659_v1 }
 0x224   : > { %v453_v44 = vpop.xlane.xlu2 %452 }
 0x225   : > { %1017 = vrcp.f32 %v453_v44  ;;  %v465_v47 = vand.u32 2147483648, %v453_v44  ;;  %vm459_vm7 = vweird.f32 %v453_v44  ;;  %v463_v49 = vand.u32 2147483647, %v453_v44 }
 0x226   : > { %1019 = vpow2.f32 %v637_v59 }
 0x227   : > { %v466_v51 = vor.u32 1.1754944e-38, %v465_v47  ;;  %vm464_vm10 = vcmp.eq.f32.partialorder %v463_v49, 8.507059e+37 }
 0x22b   : > { %v1018_v45 = vpop.eup %1017 }
 0x22c   : > { %v455_v46 = vmul.f32 %v1018_v45, %v453_v44  ;;  %vm460_vm8 = vweird.f32 %v1018_v45  ;;  %v1020_v63 = vpop.eup %1019 }
 0x22d   : > { %vm461_vm9 = vmor %vm459_vm7, %vm460_vm8  ;;  %v639_v0 = vsel %vm360_vm2, %v1020_v63, 0.0 }
 0x22e   : > { %v456_v48 = vsub.f32 1.0, %v455_v46 }
 0x230   : > { %v457_v50 = vmul.f32 %v1018_v45, %v456_v48 }
 0x232   : > { %v458_v52 = vadd.f32 %v1018_v45, %v457_v50 }
 0x234   : > { %v462_v53 = vsel %vm461_vm9, %v1018_v45, %v458_v52 }
 0x235   : > { %v467_v55 = vsel %vm464_vm10, %v466_v51, %v462_v53 }
 0x236   : > { %v468_v56 = vmul.f32 %v1016_v32, %v467_v55 }
 0x237   : > { %v405_v57 = vpop.f32.mrf.mxu1 }
 0x238   : > { %408 = vst.msk [vmem:[%s1432_s26] sm:$0xff] %vm332_vm0, %v405_v57 }
 0x239   : > { %912 = vst.msk [vmem:[%s1426_s25 + $0x8] sm:$0xff] %vm360_vm2, %v468_v56 }
 0x23f   : > { %v535_v60 = vpop.f32.mrf.mxu1 }
 0x240   : > { %v538_v61 = vsel %vm327_vm1, -1e+30, %v535_v60 }
 0x241   : > { %v539_v62 = vsel %vm360_vm2, %v538_v61, -inf }
 0x242   : > { %540 = vmax.xlane.f32.xlu1 %v539_v62 }
 0x24a   : > { %640 = vadd.xlane.f32.xlu1 %v639_v0 }
 0x263   : > { %564 = vrot.lane.b32.xlu1 %v1413_v22, %s1238_s8 }
 0x2b5   : > { %v541_v2 = vpop.xlane.xlu1 %540 }
 0x2b6   : > { %v542_v3 = vsub.f32 %v538_v61, %v541_v2 }
 0x2b8   : > { %v543_v4 = vmul.f32 1.442695, %v542_v3 }
 0x2ba   : > { %1021 = vpow2.f32 %v543_v4 }
 0x2bd   : > { %v641_v7 = vpop.xlane.xlu1 %640 }
 0x2be   : > { %1023 = vrcp.f32 %v641_v7  ;;  %v653_v11 = vand.u32 2147483648, %v641_v7  ;;  %v651_v13 = vand.u32 2147483647, %v641_v7  ;;  %vm647_vm12 = vweird.f32 %v641_v7 }
 0x2c0   : > { %v1022_v5 = vpop.eup %1021  ;;  %v654_v15 = vor.u32 1.1754944e-38, %v653_v11  ;;  %vm652_vm14 = vcmp.eq.f32.partialorder %v651_v13, 8.507059e+37 }
 0x2c1   : > { %v545_v6 = vsel %vm360_vm2, %v1022_v5, 0.0 }
 0x2c2   : > { %546 = vadd.xlane.f32.xlu2 %v545_v6 }
 0x2c4   : > { %v1024_v8 = vpop.eup %1023 }
 0x2c5   : > { %v643_v9 = vmul.f32 %v1024_v8, %v641_v7  ;;  %vm648_vm11 = vweird.f32 %v1024_v8 }
 0x2c6   : > { %vm649_vm13 = vmor %vm647_vm12, %vm648_vm11 }
 0x2c7   : > { %v644_v10 = vsub.f32 1.0, %v643_v9 }
 0x2c9   : > { %v645_v12 = vmul.f32 %v1024_v8, %v644_v10 }
 0x2cb   : > { %v646_v14 = vadd.f32 %v1024_v8, %v645_v12 }
 0x2cd   : > { %v650_v16 = vsel %vm649_vm13, %v1024_v8, %v646_v14 }
 0x2ce   : > { %v655_v17 = vsel %vm652_vm14, %v654_v15, %v650_v16 }
 0x2cf   : > { %v656_v18 = vmul.f32 %v1020_v63, %v655_v17 }
 0x2d1   : > { %919 = vmatmul.msk.f32.vlgmr.msrb.gmra.mxu2 %vm360_vm2, %v656_v18  ;;  %920 = vst.msk [vmem:[%s1426_s25 + $0x18] sm:$0xff] %vm360_vm2, %v656_v18 }
 0x2d5   : > { %v565_v24 = vpop.permute.xlu1 %564 }
 0x2da   : > { %470 = vrot.lane.b32.xlu2 %v1413_v22, %s1237_s6 }
 0x335   : > { %v547_v19 = vpop.xlane.xlu2 %546 }
 0x336   : > { %1025 = vrcp.f32 %v547_v19  ;;  %v559_v26 = vand.u32 2147483648, %v547_v19  ;;  %v557_v28 = vand.u32 2147483647, %v547_v19  ;;  %vm553_vm0 = vweird.f32 %v547_v19 }
 0x338   : > { %v560_v22 = vor.u32 1.1754944e-38, %v559_v26  ;;  %vm558_vm3 = vcmp.eq.f32.partialorder %v557_v28, 8.507059e+37 }
 0x33c   : > { %v1026_v20 = vpop.eup %1025 }
 0x33d   : > { %v549_v21 = vmul.f32 %v1026_v20, %v547_v19  ;;  %v471_v23 = vpop.permute.xlu2 %470  ;;  %vm554_vm15 = vweird.f32 %v1026_v20 }
 0x33e   : > { %491 = vmatpush.msra.mxu3 %v471_v23  ;;  %vm555_vm1 = vmor %vm553_vm0, %vm554_vm15 }
 0x33f   : > { %v550_v25 = vsub.f32 1.0, %v549_v21  ;;  %911 = vmatmul.msk.f32.vlgmr.msra.gmra.mxu3 %vm360_vm2, %v468_v56 }
 0x340   : > { %585 = vmatpush.msrb.mxu3 %v565_v24 }
 0x341   : > { %v551_v27 = vmul.f32 %v1026_v20, %v550_v25 }
 0x343   : > { %v552_v29 = vadd.f32 %v1026_v20, %v551_v27 }
 0x345   : > { %v556_v30 = vsel %vm555_vm1, %v1026_v20, %v552_v29 }
 0x346   : > { %v561_v31 = vsel %vm558_vm3, %v560_v22, %v556_v30 }
 0x347   : > { %v562_v32 = vmul.f32 %v1022_v5, %v561_v31 }
 0x349   : > { %915 = vmatmul.msk.f32.vlgmr.msrb.gmra.mxu3 %vm360_vm2, %v562_v32  ;;  %916 = vst.msk [vmem:[%s1426_s25 + $0x10] sm:$0xff] %vm360_vm2, %v562_v32 }
 0x354   : > { %v681_v33 = vpop.f32.mrf.mxu2 }
 0x355   : > { %685 = vrot.lane.b32.xlu1 %v681_v33, %s1237_s6 }
 0x3c2   : > { %v493_v34 = vpop.f32.mrf.mxu3 }
 0x3c3   : > { %497 = vrot.lane.b32.xlu2 %v493_v34, %s1239_s21 }
 0x3c4   : > { %1144 = shalt.err (!%p1141_p13)
}
 0x3c5   : > { %s1240_s21 = smov 128   ;;  %s1241_s27 = smov 8   ;;  %vm500_vm2 = vcmask 523520   ;;  %vm594_vm4 = vcmask 785920   ;;  %vm688_vm5 = vcmask 1048320  }
 0x3c6   : > { %936 = dma.vmem_to_hbm [thread:$0]  (%p1322_p9), %s727_s11, 512, %s729_s13, %s698_s22, %s1240_s21, %s1240_s21, %s1241_s27  }
 0x3c7   : > { %s923_s24 = sshll.u32 %s1227_s18, 3  ;;  %s711_s14 = sshll.u32 %s1432_s26, 4  ;;  %v686_v38 = vpop.permute.xlu1 %685  ;;  %s712_s14 = int_to_ptr.vmem [resolvable:$true] %s711_s14 }
 0x3c8   : > { %s709_s12 = scalar_lea.hbm %s1519_s3, %s923_s24  ;;  %s1165_s1 = scalar_lea.hbm %s1519_s3, 16 }
 0x3c9   : > { %s713_s9 = sshll.u32 %s709_s12, 4  ;;  %s714_s9 = int_to_ptr.hbm [resolvable:$true] %s713_s9 }
 0x3ca   : > { %s1159_s11 = sshra.s32 %s714_s9, 4  ;;  %s1160_s11 = int_to_ptr.hbm [resolvable:$true] %s1159_s11 }
 0x3cb   : > { %s1161_s13 = scalar_lea.hbm %s1160_s11, 8  ;;  %p1166_p3 = scmp.lt.s32.totalorder %s1160_s11, %s1519_s3 }
 0x3cc   : > { %v587_v35 = vpop.f32.mrf.mxu3  ;;  %p1162_p0 = scmp.ne.s32.totalorder %s1160_s11, %s1161_s13  ;;  %p1167_p4 = scmp.lt.s32.totalorder %s1165_s1, %s1161_s13 }
 0x3cd   : > { %591 = vrot.lane.b32.xlu0 %v587_v35, %s1238_s8  ;;  %s693_s8 = scalar_lea.sflag [#allocation4], %s1368_s23 }
 0x3ce   : > { %p1163_p1 = pnand %p1162_p0, %p1322_p9  ;;  %p1168_p5 = por %p1167_p4, %p1166_p3 }
 0x3d0   : > { %p1164_p2 = pneg %p1163_p1 }
 0x3d2   : > { %p1169_p6 = pnand %p1168_p5, %p1164_p2 }
 0x41d   : > { %v498_v36 = vpop.permute.xlu2 %497 }
 0x41e   : > { %501 = vst.msk [vmem:[%s1432_s26] sm:$0xff] %vm500_vm2, %v498_v36 }
 0x43f   : > { %v592_v37 = vpop.permute.xlu0 %591 }
 0x440   : > { %595 = vst.msk [vmem:[%s1432_s26] sm:$0xff] %vm594_vm4, %v592_v37 }
 0x441   : > { %689 = vst.msk [vmem:[%s1432_s26] sm:$0xff] %vm688_vm5, %v686_v38 }
 0x442   : > { %1172 = shalt.err (!%p1169_p6)
}
 0x443   : > { %935 = dma.vmem_to_hbm [thread:$0]  (%p1322_p9), %s712_s14, 128, %s714_s9, %s693_s8  }
 0x444 PF: > { %s743_s23 = sand.u32 1, %s1215_s15   ;;  %p950_p7 = pnand %p893_p12, %p1329_p11 }
 0x445   : > { %s744_s26 = scalar_lea.sflag [#allocation4], %s743_s23 }
 0x446   : > { %p951_p8 = pneg %p950_p7 }
 0x448   : > { %1206 = dma.done.wait (%p951_p8), %s744_s26, 128  }
 0x449   : > { %1208 = vsyncadd (%p951_p8), %s744_s26, 4294967168  ;;  %s754_s17 = scalar_lea.sflag [#allocation10], %s743_s23 }
 0x44a   : > { %1210 = dma.done.wait (%p951_p8), %s754_s17, 512  }
 0x44b   : > { %1212 = vsyncadd (%p951_p8), %s754_s17, 4294966784  ;;  %s27_s20 = sadd.s32 1, %s1235_s20   ;;  %s1536_s28 = sld [smem:[#allocation15_spill]] }
 0x44c   : > { %p24_p10 = scmp.ge.s32.totalorder %s27_s20, 4   ;;  %s1537_s17 = sld [smem:[#allocation18_spill]] }
 0x44d   : > { %s1538_s18 = sld [smem:[#allocation16_spill]]  ;;  %s1540_s15 = smov %s1219_s16 }
 0x44e   : > { %s1539_s19 = sld [smem:[#allocation17_spill]]  ;;  %26 = sbr.rel (!%p24_p10) target bundleno = 12 (0xc), region = 121 }
 0x451   : > { %s1541_s16 = smov %s1536_s28 }
 0x453   :  { %760 = vsyncpa [#allocation3], 1 }
 0x454   :  { %762 = vsyncpa [#allocation3 + $0x1], 1 }
 0x455   :  { %763 = vsyncpa [#allocation6], 1 }
 0x456   :  { %765 = vsyncpa [#allocation6 + $0x1], 1 }
 0x457   :  { %766 = vsyncpa [#allocation4], 1 }
 0x458   :  { %768 = vsyncpa [#allocation4 + $0x1], 1 }
 0x459   :  { %769 = vsyncpa [#allocation10], 1 }
 0x45a   :  { %771 = vsyncpa [#allocation10 + $0x1], 1 }

</bundles_post_ra>
